<compile_context>
chip_gen: v7x
topology: tpu7x:2x2x1
jax: 0.10.0
libtpu: 0.0.40
codegen_flags: <defaults>
</compile_context>

<pallas_src>
import functools

import jax
import jax.numpy as jnp
from jax.experimental import pallas as pl
from jax.experimental.pallas import tpu as pltpu

_LANE = 128
# Total double-buffered VMEM budget (3 arrays x 2 pipeline buffers), per chip.
_VMEM_BUDGET = {"v7x": 24 << 20, "v6e": 24 << 20, "v5e": 12 << 20, "other": 12 << 20}


def _round_up(x: int, m: int) -> int:
    return ((x + m - 1) // m) * m


def _sublane_multiple(dtype) -> int:
    itemsize = jnp.dtype(dtype).itemsize
    if itemsize >= 4:
        return 8
    if itemsize == 2:
        return 16
    return 32


def _chip() -> str:
    """Best-effort chip-generation detection (conservative default)."""
    try:
        kind = jax.devices()[0].device_kind.lower()
    except Exception:
        kind = ""
    if "v7" in kind or "tpu7" in kind:
        return "v7x"
    if "v6" in kind:
        return "v6e"
    if "v5" in kind and ("lite" in kind or "v5e" in kind):
        return "v5e"
    return "other"


# ---------------------------------------------------------------------------
# Generic residual add: out = fn(x) + x, as a streaming Pallas kernel.
# ---------------------------------------------------------------------------
def _residual_add_kernel(y_ref, x_ref, o_ref):
    # Promote dtypes in-kernel: operands arrive at their native width and the
    # VPU cast is free in a DMA-bound kernel.
    o_ref[...] = y_ref[...].astype(o_ref.dtype) + x_ref[...].astype(o_ref.dtype)


def residual_add(y, x):
    """Element-wise y + x via a Pallas TPU kernel (matching shapes)."""
    assert y.shape == x.shape, (y.shape, x.shape)
    out_dtype = jnp.promote_types(y.dtype, x.dtype)
    orig_shape = x.shape
    n = x.size
    if n == 0:
        return (y.astype(out_dtype) + x.astype(out_dtype)).reshape(orig_shape)

    chip = _chip()
    isz_total = (jnp.dtype(y.dtype).itemsize + jnp.dtype(x.dtype).itemsize
                 + jnp.dtype(out_dtype).itemsize)
    yf = jnp.ravel(y)
    xf = jnp.ravel(x)

    # Lane-dense layout: (rows, cols) with cols a multiple of 128.
    cols = next((c for c in (1024, 512, 256, 128) if n % c == 0), None)

    if cols is None:
        # Ragged total size: run the flat data as one (1, n) row.  Pallas masks
        # the partial lane-edge block, so no jnp.pad / slice (each of those
        # would cost a full extra HBM read+write per operand).  The 1-sublane
        # layout wastes vreg packing, but this rare path stays DMA-bound.
        rows2d, cols2d = 1, n
        block = (1, n if n <= 32768 else 32768)
        grid = (pl.cdiv(n, block[1]),)
        idx = lambda i: (0, i)
    else:
        rows2d, cols2d = n // cols, cols
        sub = _sublane_multiple(out_dtype)
        # Per grid step VMEM: 2 pipeline buffers x block_rows x cols x (all 3 dtypes).
        budget = _VMEM_BUDGET[chip]
        max_rows = max(sub, (budget // (2 * cols * isz_total)) // sub * sub)
        block_rows = rows2d if rows2d <= max_rows else max_rows
        # v7x only: the two TensorCores share the "parallel" axis -> keep an
        # even (>=4) step count so neither core gets a 2x tail.  Single-core
        # v5e/v6e keep one big block when it fits (no pure-overhead split).
        if chip == "v7x" and rows2d > sub and n * isz_total >= (2 << 20):
            nblk = pl.cdiv(rows2d, block_rows)
            nblk = 4 if nblk < 4 else (nblk + 1 if nblk % 2 else nblk)
            block_rows = min(block_rows,
                             max(sub, _round_up(pl.cdiv(rows2d, nblk), sub)))
        block = (block_rows, cols)
        grid = (pl.cdiv(rows2d, block_rows),)
        idx = lambda i: (i, 0)

    y2 = yf.reshape(rows2d, cols2d)
    x2 = xf.reshape(rows2d, cols2d)

    # Reuse fn(x)'s slab as the output buffer when dtypes match (saving only
    # realized if y is dead after the call; XLA copies defensively otherwise).
    alias = {0: 0} if y.dtype == out_dtype else {}

    out = pl.pallas_call(
        _residual_add_kernel,
        out_shape=jax.ShapeDtypeStruct((rows2d, cols2d), out_dtype),
        grid_spec=pl.GridSpec(
            grid=grid,
            in_specs=[pl.BlockSpec(block, idx), pl.BlockSpec(block, idx)],
            out_specs=pl.BlockSpec(block, idx),
        ),
        input_output_aliases=alias,
        compiler_params=pltpu.CompilerParams(dimension_semantics=("parallel",)),
        cost_estimate=pl.CostEstimate(
            flops=int(n), transcendentals=0, bytes_accessed=int(n) * isz_total),
    )(y2, x2)
    return out.reshape(orig_shape)


# ---------------------------------------------------------------------------
# Demo `fn`: 1x1 conv (channel mix) + bias over NCHW, as a Pallas kernel with
# an optional fused residual epilogue (the highest-impact optimization).
# ---------------------------------------------------------------------------
def _spatial_tile(hw: int) -> int:
    if hw % _LANE != 0:
        return hw  # full spatial extent -> always a legal block
    for t in (2048, 1024, 512, 256, 128):
        if hw % t == 0:
            return t
    return hw


def _conv1x1_kernel(x_ref, w_ref, b_ref, o_ref, *, fuse_residual: bool):
    # x_ref: (1, C, THW) activation block; w_ref: (O, C); b_ref: (O, 1).
    x = x_ref[0]
    w = w_ref[...]
    out_ch, in_ch = w.shape
    if in_ch >= 8 and out_ch >= 8:
        y = jnp.dot(w, x, preferred_element_type=jnp.float32)  # MXU path
    else:
        # Tiny channel count: the MXU would be <4% utilized, so do the
        # contraction as unrolled VPU broadcast-MACs instead.
        y = jnp.zeros((out_ch, x.shape[1]), jnp.float32)
        for c in range(in_ch):
            y = y + (w[:, c:c + 1].astype(jnp.float32)
                     * x[c:c + 1, :].astype(jnp.float32))
    y = y + b_ref[...].astype(jnp.float32)
    if fuse_residual:
        # Residual epilogue fused at the output store: fn(x) never round-trips
        # through HBM and no standalone add kernel is launched.
        y = y + x.astype(jnp.float32)
    o_ref[0] = y.astype(o_ref.dtype)


def conv1x1(x, w, b, *, fuse_residual=False):
    """1x1 conv over NCHW channels (+bias), optionally fusing the `+ x`."""
    batch, in_ch, hgt, wid = x.shape
    out_ch = w.shape[0]
    assert w.shape == (out_ch, in_ch) and b.shape == (out_ch,)
    if fuse_residual and out_ch != in_ch:
        raise ValueError("fused residual requires out_channels == in_channels")
    hw = hgt * wid
    thw = _spatial_tile(hw)
    x3 = x.reshape(batch, in_ch, hw)       # free reshape (contiguous dims)
    b2 = b.reshape(out_ch, 1)
    isz = jnp.dtype(x.dtype).itemsize
    out = pl.pallas_call(
        functools.partial(_conv1x1_kernel, fuse_residual=fuse_residual),
        out_shape=jax.ShapeDtypeStruct((batch, out_ch, hw), x.dtype),
        grid_spec=pl.GridSpec(
            grid=(batch, pl.cdiv(hw, thw)),
            in_specs=[
                pl.BlockSpec((1, in_ch, thw), lambda bi, si: (bi, 0, si)),
                pl.BlockSpec((out_ch, in_ch), lambda bi, si: (0, 0)),
                pl.BlockSpec((out_ch, 1), lambda bi, si: (0, 0)),
            ],
            out_specs=pl.BlockSpec((1, out_ch, thw), lambda bi, si: (bi, 0, si)),
        ),
        compiler_params=pltpu.CompilerParams(
            dimension_semantics=("parallel", "parallel")),
        cost_estimate=pl.CostEstimate(
            flops=2 * batch * hw * out_ch * in_ch
            + (batch * out_ch * hw if fuse_residual else 0),
            transcendentals=0,
            bytes_accessed=(x.size + w.size + b.size + batch * out_ch * hw) * isz,
        ),
    )(x3, w, b2)
    return out.reshape(batch, out_ch, hgt, wid)


class Conv1x1:
    """Deterministic demo fn: 1x1 conv + bias (fusion-capable Pallas kernel)."""

    def __init__(self, w, b):
        self.w = w
        self.b = b

    def __call__(self, x):
        return conv1x1(x, self.w, self.b, fuse_residual=False)

    def fused_residual_call(self, x):
        return conv1x1(x, self.w, self.b, fuse_residual=True)

    def reference(self, x):
        y = jnp.einsum("oc,bchw->bohw", self.w, x,
                       precision=jax.lax.Precision.HIGHEST)
        return y + self.b[None, :, None, None]


def make_demo_fn(channels, key):
    kw, kb = jax.random.split(key)
    w = jax.random.normal(kw, (channels, channels), dtype=jnp.float32) * 0.1
    b = jax.random.normal(kb, (channels,), dtype=jnp.float32) * 0.01
    return Conv1x1(w, b)


# ---------------------------------------------------------------------------
# Residual module: x + fn(x)
# ---------------------------------------------------------------------------
class Residual:
    """JAX/Pallas equivalent of the PyTorch Residual module: x + fn(x).

    If `fn` exposes `fused_residual_call`, the `+ x` is folded into fn's own
    Pallas epilogue (no HBM round-trip of fn(x)); otherwise the generic
    streaming-add kernel is used.
    """

    def __init__(self, fn):
        self.fn = fn

    def __call__(self, x, *args, **kwargs):
        fused = getattr(self.fn, "fused_residual_call", None)
        if fused is not None:
            return fused(x, *args, **kwargs)
        # TODO(synk): arbitrary Python callables cannot be fused into a single
        # Pallas kernel; only the residual add runs as a kernel on this path.
        return residual_add(self.fn(x, *args, **kwargs), x)


if __name__ == "__main__":
    key = jax.random.PRNGKey(0)
    kx, kfn, kx2, kx3 = jax.random.split(key, 4)

    # --- Primary demo: Residual around the fusion-capable Pallas 1x1 conv. ---
    B, C, H, W = 2, 4, 16, 16
    x = jax.random.normal(kx, (B, C, H, W), dtype=jnp.float32)
    fn = make_demo_fn(C, kfn)
    residual = Residual(fn)

    out = jax.block_until_ready(residual(x))
    ref = fn.reference(x) + x
    assert out.shape == x.shape and out.dtype == x.dtype
    assert jnp.allclose(out, ref, atol=1e-5, rtol=1e-5)

    # Fused epilogue must agree with (unfused Pallas conv) + (Pallas add).
    out_unfused = jax.block_until_ready(residual_add(fn(x), x))
    assert jnp.allclose(out, out_unfused, atol=1e-6, rtol=1e-6)

    # --- Generic-fn fallback path through the class (standalone add kernel).
    residual_tanh = Residual(jnp.tanh)
    out_t = jax.block_until_ready(residual_tanh(x))
    assert jnp.allclose(out_t, jnp.tanh(x) + x, atol=1e-6, rtol=1e-6)

    # --- Multi-block path (grid >= 2 on every generation). ---
    x2 = jax.random.normal(kx2, (8, 16, 128, 128), dtype=jnp.float32)
    y2 = 0.5 * x2 - 1.0
    out2 = jax.block_until_ready(residual_add(y2, x2))
    assert jnp.allclose(out2, y2 + x2, atol=1e-6, rtol=1e-6)

    # --- Mixed dtypes: bf16 fn(x) + f32 x, promoted in-kernel. ---
    y3 = (0.25 * x).astype(jnp.bfloat16)
    out3 = jax.block_until_ready(residual_add(y3, x))
    assert out3.dtype == jnp.float32
    assert jnp.allclose(out3, y3.astype(jnp.float32) + x, atol=1e-6, rtol=1e-6)

    # --- Ragged size (not 128-divisible): masked (1, n) path, no padding. ---
    x4 = jax.random.normal(kx3, (13, 999), dtype=jnp.float32)
    y4 = 2.0 * x4 + 0.5
    out4 = jax.block_until_ready(residual_add(y4, x4))
    assert jnp.allclose(out4, y4 + x4, atol=1e-6, rtol=1e-6)

    print("KERNEL_OK")
</pallas_src>

<mosaic_0001>
module attributes {stable_mosaic.version = 11 : i64} {
  func.func @_conv1x1_kernel(%arg0: i32, %arg1: i32, %arg2: memref<1x4x256xf32, #tpu.memory_space<vmem>>, %arg3: memref<4x4xf32, #tpu.memory_space<vmem>>, %arg4: memref<4x1xf32, #tpu.memory_space<vmem>>, %arg5: memref<1x4x256xf32, #tpu.memory_space<vmem>>) attributes {dimension_semantics = [#tpu.dimension_semantics<parallel>, #tpu.dimension_semantics<parallel>], iteration_bounds = array<i64: 2, 1>, scalar_prefetch = 0 : i64, scratch_operands = 0 : i64, tpu.core_type = #tpu.core_type<tc>, window_params = [{transform_indices = @transform_0, window_bounds = array<i64: 1, 4, 256>}, {pipeline_mode = #tpu.pipeline_mode<synchronous>, transform_indices = @transform_1, window_bounds = array<i64: 4, 4>}, {pipeline_mode = #tpu.pipeline_mode<synchronous>, transform_indices = @transform_2, window_bounds = array<i64: 4, 1>}, {transform_indices = @transform_3, window_bounds = array<i64: 1, 4, 256>}]} {
    %c0 = arith.constant 0 : index
    %c0_0 = arith.constant 0 : index
    %c0_1 = arith.constant 0 : index
    %0 = vector.load %arg2[%c0, %c0_0, %c0_1] : memref<1x4x256xf32, #tpu.memory_space<vmem>>, vector<1x4x256xf32>
    %1 = vector.shape_cast %0 : vector<1x4x256xf32> to vector<4x256xf32>
    %c0_2 = arith.constant 0 : index
    %c0_3 = arith.constant 0 : index
    %2 = vector.load %arg3[%c0_2, %c0_3] : memref<4x4xf32, #tpu.memory_space<vmem>>, vector<4x4xf32>
    %cst = arith.constant 0.000000e+00 : f32
    %3 = vector.broadcast %cst : f32 to vector<4x256xf32>
    %4 = vector.extract_strided_slice %2 {offsets = [0, 0], sizes = [4, 1], strides = [1, 1]} : vector<4x4xf32> to vector<4x1xf32>
    %5 = vector.extract_strided_slice %1 {offsets = [0, 0], sizes = [1, 256], strides = [1, 1]} : vector<4x256xf32> to vector<1x256xf32>
    %6 = vector.broadcast %4 : vector<4x1xf32> to vector<4x256xf32>
    %7 = vector.broadcast %5 : vector<1x256xf32> to vector<4x256xf32>
    %8 = arith.mulf %6, %7 : vector<4x256xf32>
    %9 = arith.addf %3, %8 : vector<4x256xf32>
    %10 = vector.extract_strided_slice %2 {offsets = [0, 1], sizes = [4, 1], strides = [1, 1]} : vector<4x4xf32> to vector<4x1xf32>
    %11 = vector.extract_strided_slice %1 {offsets = [1, 0], sizes = [1, 256], strides = [1, 1]} : vector<4x256xf32> to vector<1x256xf32>
    %12 = vector.broadcast %10 : vector<4x1xf32> to vector<4x256xf32>
    %13 = vector.broadcast %11 : vector<1x256xf32> to vector<4x256xf32>
    %14 = arith.mulf %12, %13 : vector<4x256xf32>
    %15 = arith.addf %9, %14 : vector<4x256xf32>
    %16 = vector.extract_strided_slice %2 {offsets = [0, 2], sizes = [4, 1], strides = [1, 1]} : vector<4x4xf32> to vector<4x1xf32>
    %17 = vector.extract_strided_slice %1 {offsets = [2, 0], sizes = [1, 256], strides = [1, 1]} : vector<4x256xf32> to vector<1x256xf32>
    %18 = vector.broadcast %16 : vector<4x1xf32> to vector<4x256xf32>
    %19 = vector.broadcast %17 : vector<1x256xf32> to vector<4x256xf32>
    %20 = arith.mulf %18, %19 : vector<4x256xf32>
    %21 = arith.addf %15, %20 : vector<4x256xf32>
    %22 = vector.extract_strided_slice %2 {offsets = [0, 3], sizes = [4, 1], strides = [1, 1]} : vector<4x4xf32> to vector<4x1xf32>
    %23 = vector.extract_strided_slice %1 {offsets = [3, 0], sizes = [1, 256], strides = [1, 1]} : vector<4x256xf32> to vector<1x256xf32>
    %24 = vector.broadcast %22 : vector<4x1xf32> to vector<4x256xf32>
    %25 = vector.broadcast %23 : vector<1x256xf32> to vector<4x256xf32>
    %26 = arith.mulf %24, %25 : vector<4x256xf32>
    %27 = arith.addf %21, %26 : vector<4x256xf32>
    %c0_4 = arith.constant 0 : index
    %c0_5 = arith.constant 0 : index
    %28 = vector.load %arg4[%c0_4, %c0_5] : memref<4x1xf32, #tpu.memory_space<vmem>>, vector<4x1xf32>
    %29 = vector.broadcast %28 : vector<4x1xf32> to vector<4x256xf32>
    %30 = arith.addf %27, %29 : vector<4x256xf32>
    %31 = arith.addf %30, %1 : vector<4x256xf32>
    %c0_6 = arith.constant 0 : index
    %c0_7 = arith.constant 0 : index
    %c0_8 = arith.constant 0 : index
    %32 = vector.load %arg5[%c0_6, %c0_7, %c0_8] : memref<1x4x256xf32, #tpu.memory_space<vmem>>, vector<1x4x256xf32>
    %33 = vector.shape_cast %32 : vector<1x4x256xf32> to vector<4x256xf32>
    %34 = vector.shape_cast %31 : vector<4x256xf32> to vector<1x4x256xf32>
    tpu.vector_store %arg5[%c0_6, %c0_7, %c0_8], %34 {strides = array<i32>} : memref<1x4x256xf32, #tpu.memory_space<vmem>>, vector<1x4x256xf32>,
    return
  }
  func.func @transform_0(%arg0: i32, %arg1: i32) -> (i32, i32, i32) {
    %c0_i32 = arith.constant 0 : i32
    %c0_i32_0 = arith.constant 0 : i32
    return %arg0, %c0_i32, %arg1 : i32, i32, i32
  }
  func.func @transform_1(%arg0: i32, %arg1: i32) -> (i32, i32) {
    %c0_i32 = arith.constant 0 : i32
    %c0_i32_0 = arith.constant 0 : i32
    %c0_i32_1 = arith.constant 0 : i32
    return %c0_i32, %c0_i32_0 : i32, i32
  }
  func.func @transform_2(%arg0: i32, %arg1: i32) -> (i32, i32) {
    %c0_i32 = arith.constant 0 : i32
    %c0_i32_0 = arith.constant 0 : i32
    %c0_i32_1 = arith.constant 0 : i32
    return %c0_i32, %c0_i32_0 : i32, i32
  }
  func.func @transform_3(%arg0: i32, %arg1: i32) -> (i32, i32, i32) {
    %c0_i32 = arith.constant 0 : i32
    %c0_i32_0 = arith.constant 0 : i32
    return %arg0, %c0_i32, %arg1 : i32, i32, i32
  }
}

</mosaic_0001>

<bundles_post_ra>
// kernel: tpu_custom_call.1
= control target key start
LH: loop header
LB: loop body
LE: loop exit
PB: predicated region body
PF: predicated region fallthrough
CT: control target
= control target key end

     0   :  { %8 = vsyncpa [#allocation3], 0  ;;  %s845_s0 = inlined_call_operand.hbm [shape: f32[2,4,256], index: 0, kind: input, shape index: {}]   ;;  %s846_s1 = inlined_call_operand.vmem [shape: f32[4,4], index: 1, kind: input, shape index: {}]   ;;  %s847_s2 = inlined_call_operand.vmem [shape: f32[4,1], index: 2, kind: input, shape index: {}]   ;;  %s848_s3 = inlined_call_operand.hbm [shape: f32[2,4,256], index: 3, kind: output, shape index: {}]  }
   0x1   :  { %10 = vsyncpa [#allocation3 + $0x1], 0 }
   0x2   :  { %11 = vsyncpa [#allocation4], 0 }
   0x3   :  { %13 = vsyncpa [#allocation4 + $0x1], 0  ;;  %s663_s12 = smov 0   ;;  %s665_s13 = smov 0  }
   0x4   :  { %s667_s14 = smov 0   ;;  %s669_s15 = smov 0  }
   0x5   :  { %s671_s16 = smov 0   ;;  %s673_s17 = smov 0  }
   0x6 LB: > { %s433_s18 = sadd.s32 4294967295, %s635_s17   ;;  %s434_s19 = sadd.s32 4294967294, %s635_s17   ;;  %s635_s17 = sphi %s673_s17, %s19_s17   ;;  %s631_s16 = sphi %s671_s16, %s864_s16   ;;  %s627_s15 = sphi %s669_s15, %s863_s15   ;;  %s623_s14 = sphi %s667_s14, %s862_s14   ;;  %s619_s13 = sphi %s665_s13, %s861_s13   ;;  %s615_s12 = sphi %s663_s12, %s860_s12  }
   0x7   : > { %s31_s20 = sadd.s32 1, %s631_s16  ;;  %s40_s21 = sadd.s32 1, %s623_s14 }
   0x8   : > { %p33_p0 = scmp.ge.s32.totalorder %s31_s20, 2  ;;  %p47_p1 = scmp.ne.s32.totalorder %s623_s14, %s619_s13 }
   0x9   : > { %p48_p2 = scmp.eq.s32.totalorder %s635_s17, 0  ;;  %p53_p3 = scmp.ne.s32.totalorder %s619_s13, %s615_s12 }
   0xa   : > { %s866_s20 = smov (%p33_p0, %s31_s20), 0  ;;  %p54_p5 = scmp.eq.s32.totalorder %s433_s18, 0 }
   0xb   : > { %p704_p4 = por %p48_p2, %p47_p1  ;;  %s35_s23 = ssub.s32 %s631_s16, %s866_s20 }
   0xc   : > { %p121_p6 = scmp.eq.s32.totalorder %s433_s18, 1  ;;  %p38_p7 = scmp.eq.s32.totalorder %s35_s23, 0 }
   0xd   : > { %p710_p8 = por %p54_p5, %p53_p3  ;;  %p127_p10 = scmp.eq.s32.totalorder %s434_s19, 1 }
   0xe   : > { %p714_p9 = por %p121_p6, %p47_p1  ;;  %p462_p13 = scmp.lt.s32.totalorder %s635_s17, 2 }
   0xf   : > { %s719_s26 = scalar_select %p38_p7, %s623_s14, %s40_s21  }
  0x10   : > { %s852_s25 = scalar_select %p714_p9, 1, 0 }
  0x11   : > { %p721_p11 = por %p127_p10, %p53_p3  ;;  %s153_s28 = sand.u32 1, %s623_s14  }
  0x12   : > { %s437_s29 = sshll.u32 %s153_s28, 3  ;;  %s448_s30 = sshll.u32 %s631_s16, 7 }
  0x13   : > { %s853_s27 = scalar_select %p721_p11, 1, 0 }
  0x14   : > { %s732_s6 = scalar_lea.hbm %s845_s0, %s448_s30  ;;  %s157_s7 = scalar_lea.vmem [#allocation2], %s437_s29 }
  0x15   : > { %s167_s8 = sshll.u32 %s157_s7, 4  ;;  %p738_p0 = pnand %p462_p13, %p704_p4  ;;  %s734_s8 = int_to_ptr.vmem [resolvable:$true] %s167_s8 }
  0x16   : > { %s154_s10 = scalar_lea.sflag [#allocation3], %s153_s28  ;;  %s523_s11 = scalar_lea.hbm %s732_s6, 128 }
  0x17   : > { %p524_p3 = scmp.ne.s32.totalorder %s732_s6, %s523_s11  ;;  %p525_p5 = pneg %p738_p0 }
  0x18   : > { %s528_s21 = scalar_lea.hbm %s845_s0, 256  ;;  %p529_p4 = scmp.lt.u32.totalorder %s732_s6, %s845_s0 }
  0x19   : > { %p526_p6 = pnand %p525_p5, %p524_p3  ;;  %p530_p10 = scmp.lt.u32.totalorder %s528_s21, %s523_s11 }
  0x1a   : > { %p532_p12 = scmp.lt.u32.totalorder %s523_s11, %s732_s6 }
  0x1b   : > { %p527_p7 = pneg %p526_p6  ;;  %p531_p13 = por %p530_p10, %p529_p4 }
  0x1d   : > { %p533_p1 = por %p532_p12, %p531_p13 }
  0x1f   : > { %p534_p2 = pnand %p533_p1, %p527_p7 }
  0x21   : > { %537 = shalt.err (!%p534_p2)
}
  0x22   : > { %s538_s28 = scalar_lea.vmem %s734_s8, 128  ;;  %s637_s29 = smov [#allocation2]  }
  0x23   : > { %p539_p3 = scmp.ne.s32.totalorder %s734_s8, %s538_s28  ;;  %s543_s30 = sshll.u32 %s637_s29, 4  ;;  %s544_s30 = int_to_ptr.vmem [resolvable:$false] %s543_s30 }
  0x24   : > { %s545_s4 = scalar_lea.vmem %s544_s30, 256  ;;  %p546_p9 = scmp.lt.s32.totalorder %s734_s8, %s544_s30 }
  0x25   : > { %p541_p6 = pnand %p539_p3, %p525_p5  ;;  %p547_p4 = scmp.lt.s32.totalorder %s545_s4, %s538_s28 }
  0x27   : > { %p542_p11 = pneg %p541_p6  ;;  %p548_p10 = por %p547_p4, %p546_p9 }
  0x29   : > { %p549_p12 = pnand %p548_p10, %p542_p11 }
  0x2b   : > { %552 = shalt.err (!%p549_p12)
}
  0x2c   : > { %457 = dma.hbm_to_vmem [thread:$0]  (!%p738_p0), %s732_s6, 128, %s734_s8, %s154_s10  }
  0x2d   : > { %p855_p1 = scmp.lt.s32.totalorder %s635_s17, 3  ;;  %p856_p2 = scmp.ge.s32.totalorder %s635_s17, 1 }
  0x2f   : > { %p173_p5 = pnand %p856_p2, %p855_p1 }
  0x30   : > { %s774_s5 = sand.u32 (!%p173_p5), 1, %s619_s13  }
  0x31   : > { %176 = sbr.rel (%p173_p5) target bundleno = 220 (0xdc), region = 32  ;;  %s441_s7 = sshll.u32 (!%p173_p5), %s774_s5, 3 }
  0x32   : > { %s179_s11 = scalar_lea.sflag (!%p173_p5), [#allocation3], %s774_s5  ;;  %s182_s9 = scalar_lea.vmem (!%p173_p5), [#allocation2], %s441_s7 }
  0x38   : > { %606 = dma.done.wait (%p710_p8), %s179_s11, 128  }
  0x39   : > { %608 = vsyncadd (%p710_p8), %s179_s11, 4294967168  ;;  %v638_v0 = vmov 0   ;;  %v639_v1 = vmov 2   ;;  %v208_v2 = vld [vmem:[%s846_s1] sm:$0xf]  ;;  %v640_v3 = vmov 1   ;;  %v215_v6 = vlaneseq }
  0x3a   : > { %516 = vset.pattern.permute.xlu0 %v638_v0  ;;  %518 = vset.pattern.permute.xlu1 %v639_v1  ;;  %v641_v4 = vmov 3   ;;  %v315_v5 = vld [vmem:[%s847_s2] sm:$0xf]  ;;  %s449_s24 = sshll.u32 %s627_s15, 7  ;;  %s204_s19 = scalar_lea.vmem [#allocation5], %s441_s7 }
  0x3b   : > { %211 = vperm.xlu0 %516, %v208_v2   ;;  %264 = vperm.xlu1 %518, %v208_v2   ;;  %v216_v7 = vshrl.u32 %v215_v6, 7  ;;  %v207_v12 = vld [vmem:[%s182_s9] sm:$0xff]  ;;  %s349_s21 = sshll.u32 %s204_s19, 4  ;;  %s796_s28 = scalar_lea.hbm %s848_s3, %s449_s24  ;;  %s798_s21 = int_to_ptr.vmem [resolvable:$true] %s349_s21 }
  0x3c   : > { %v323_v52 = vcombine.high %v207_v12, %v207_v12  ;;  %s333_s29 = scalar_lea.sflag [#allocation4], %s774_s5  ;;  %s553_s30 = scalar_lea.vmem %s798_s21, 128 }
  0x3d   : > { %v217_v8 = vsub.s32 0, %v216_v7  ;;  %v221_v9 = vsub.s32 4, %v216_v7  ;;  %v243_v10 = vsub.s32 1, %v216_v7  ;;  %v247_v11 = vsub.s32 5, %v216_v7  ;;  %p554_p8 = scmp.ne.s32.totalorder %s798_s21, %s553_s30  ;;  %p857_p9 = scmp.ne.s32.totalorder %s852_s25, 0 }
  0x3e   : > { %v269_v13 = vsub.s32 2, %v216_v7  ;;  %v273_v14 = vsub.s32 6, %v216_v7  ;;  %v295_v15 = vsub.s32 3, %v216_v7  ;;  %v299_v16 = vsub.s32 7, %v216_v7  ;;  %s642_s15 = smov [#allocation5]  }
  0x3f   : > { %517 = vset.pattern.permute.xlu0 %v640_v3  ;;  %519 = vset.pattern.permute.xlu1 %v641_v4  ;;  %v218_v17 = vrot.slane %v207_v12, %v217_v8  ;;  %v222_v18 = vrot.slane %v207_v12, %v221_v9  ;;  %v244_v19 = vrot.slane %v207_v12, %v243_v10  ;;  %p555_p11 = pnand %p554_p8, %p857_p9  ;;  %s557_s4 = sshll.u32 %s642_s15, 4  ;;  %s558_s4 = int_to_ptr.vmem [resolvable:$false] %s557_s4 }
  0x40   : > { %238 = vperm.xlu0 %517, %v208_v2   ;;  %290 = vperm.xlu1 %519, %v208_v2   ;;  %v248_v20 = vrot.slane %v207_v12, %v247_v11  ;;  %v270_v21 = vrot.slane %v207_v12, %v269_v13  ;;  %v274_v22 = vrot.slane %v207_v12, %v273_v14  ;;  %s559_s7 = scalar_lea.vmem %s558_s4, 256  ;;  %p560_p7 = scmp.lt.s32.totalorder %s798_s21, %s558_s4 }
  0x41   : > { %v296_v25 = vrot.slane %v207_v12, %v295_v15  ;;  %v300_v26 = vrot.slane %v207_v12, %v299_v16  ;;  %v228_v27 = vrot.slane %v218_v17, %v217_v8  ;;  %v232_v28 = vrot.slane %v222_v18, %v217_v8  ;;  %p556_p0 = pneg %p555_p11  ;;  %p561_p13 = scmp.lt.s32.totalorder %s559_s7, %s553_s30 }
  0x42   : > { %v254_v29 = vrot.slane %v244_v19, %v243_v10  ;;  %v258_v30 = vrot.slane %v248_v20, %v243_v10  ;;  %v280_v31 = vrot.slane %v270_v21, %v269_v13  ;;  %v284_v32 = vrot.slane %v274_v22, %v269_v13 }
  0x43   : > { %v306_v33 = vrot.slane %v296_v25, %v295_v15  ;;  %v310_v34 = vrot.slane %v300_v26, %v295_v15  ;;  %p562_p3 = por %p561_p13, %p560_p7 }
  0x44   : > { %520 = vset.pattern.permute.xlu1 %v638_v0  ;;  %521 = vset.pattern.permute.xlu0 %v638_v0 }
  0x45   : > { %318 = vperm.xlu1 %520, %v315_v5   ;;  %p563_p6 = pnand %p562_p3, %p556_p0 }
  0xba   : > { %v212_v23 = vpop.permute.xlu0 %211  ;;  %v265_v24 = vpop.permute.xlu1 %264 }
  0xbb   : > { %v233_v37 = vmul.f32 %v228_v27, %v212_v23  ;;  %v234_v38 = vmul.f32 %v232_v28, %v212_v23  ;;  %v285_v41 = vmul.f32 %v280_v31, %v265_v24  ;;  %v286_v42 = vmul.f32 %v284_v32, %v265_v24 }
  0xbf   : > { %v239_v35 = vpop.permute.xlu0 %238  ;;  %v291_v36 = vpop.permute.xlu1 %290 }
  0xc0   : > { %v259_v39 = vmul.f32 %v254_v29, %v239_v35  ;;  %v260_v40 = vmul.f32 %v258_v30, %v239_v35  ;;  %v311_v45 = vmul.f32 %v306_v33, %v291_v36  ;;  %v312_v46 = vmul.f32 %v310_v34, %v291_v36 }
  0xc2   : > { %v261_v43 = vadd.f32 %v259_v39, %v233_v37  ;;  %v262_v44 = vadd.f32 %v260_v40, %v234_v38 }
  0xc4   : > { %v287_v47 = vadd.f32 %v285_v41, %v261_v43  ;;  %v288_v48 = vadd.f32 %v286_v42, %v262_v44  ;;  %v319_v49 = vpop.permute.xlu1 %318 }
  0xc6   : > { %v313_v50 = vadd.f32 %v311_v45, %v287_v47  ;;  %v314_v51 = vadd.f32 %v312_v46, %v288_v48 }
  0xc8   : > { %v321_v53 = vadd.f32 %v319_v49, %v313_v50  ;;  %v322_v54 = vadd.f32 %v319_v49, %v314_v51 }
  0xca   : > { %v325_v55 = vadd.f32 %v321_v53, %v207_v12  ;;  %v326_v56 = vadd.f32 %v323_v52, %v322_v54 }
  0xcc   : > { %v329_v57 = vcombine.low %v325_v55, %v326_v56 }
  0xce   : > { %331 = vst [vmem:[%s204_s19] sm:$0xff] %v329_v57 }
  0xcf   : > { %566 = shalt.err (!%p563_p6)
}
  0xd0   : > { %s567_s5 = scalar_lea.hbm %s796_s28, 128  ;;  %s571_s6 = scalar_lea.hbm %s848_s3, 256 }
  0xd1   : > { %p568_p4 = scmp.ne.s32.totalorder %s796_s28, %s567_s5  ;;  %p572_p1 = scmp.lt.u32.totalorder %s796_s28, %s848_s3 }
  0xd2   : > { %p573_p2 = scmp.lt.u32.totalorder %s571_s6, %s567_s5  ;;  %p575_p8 = scmp.lt.u32.totalorder %s567_s5, %s796_s28 }
  0xd3   : > { %p569_p10 = pnand %p568_p4, %p857_p9 }
  0xd4   : > { %p574_p5 = por %p573_p2, %p572_p1 }
  0xd5   : > { %p570_p12 = pneg %p569_p10 }
  0xd6   : > { %p576_p11 = por %p575_p8, %p574_p5 }
  0xd8   : > { %p577_p0 = pnand %p576_p11, %p570_p12 }
  0xda   : > { %580 = shalt.err (!%p577_p0)
}
  0xdb   : > { %452 = dma.vmem_to_hbm [thread:$0]  (%p857_p9), %s798_s21, 128, %s796_s28, %s333_s29  }
  0xdc PF: > { %s361_s18 = sand.u32 1, %s615_s12   ;;  %p858_p7 = scmp.ne.s32.totalorder %s853_s27, 0 }
  0xdd   : > { %p859_p13 = scmp.ge.s32.totalorder %s635_s17, 2  ;;  %s362_s24 = scalar_lea.sflag [#allocation4], %s361_s18 }
  0xdf   : > { %p459_p3 = pnand %p859_p13, %p858_p7 }
  0xe1   : > { %610 = dma.done.wait (!%p459_p3), %s362_s24, 128  }
  0xe2   : > { %612 = vsyncadd (!%p459_p3), %s362_s24, 4294967168  ;;  %s19_s17 = sadd.s32 1, %s635_s17   ;;  %s860_s12 = smov %s619_s13 }
  0xe3   : > { %p16_p6 = scmp.ge.s32.totalorder %s19_s17, 4   ;;  %s861_s13 = smov %s623_s14 }
  0xe4   : > { %s862_s14 = smov %s719_s26  ;;  %s863_s15 = smov %s631_s16 }
  0xe5   : > { %s864_s16 = smov %s866_s20  ;;  %18 = sbr.rel (!%p16_p6) target bundleno = 6 (0x6), region = 77 }
  0xec   :  { %367 = vsyncpa [#allocation3], 1 }
  0xed   :  { %369 = vsyncpa [#allocation3 + $0x1], 1 }
  0xee   :  { %370 = vsyncpa [#allocation4], 1 }
  0xef   :  { %372 = vsyncpa [#allocation4 + $0x1], 1 }

</bundles_post_ra>
